<compile_context>
chip_gen: v7x
topology: tpu7x:2x2x1
jax: 0.10.0
libtpu: 0.0.40
codegen_flags: <defaults>
</compile_context>

<pallas_src>
import functools
import math

import jax
import jax.numpy as jnp
from jax.experimental import pallas as pl
from jax.experimental.pallas import tpu as pltpu


# ---------------------------------------------------------------------------
# Glue: 1-D bilinear interpolation matrix (matches PyTorch F.interpolate).
# ---------------------------------------------------------------------------
def _bilinear_matrix(out_size: int, in_size: int, align_corners: bool) -> jnp.ndarray:
    o = jnp.arange(out_size, dtype=jnp.float32)
    if align_corners:
        if out_size > 1:
            src = o * (in_size - 1) / (out_size - 1)
        else:
            src = jnp.zeros_like(o)
    else:
        # PyTorch: src = (o + 0.5) * (in/out) - 0.5, clamped at 0
        src = jnp.maximum((o + 0.5) * (in_size / out_size) - 0.5, 0.0)
    i0 = jnp.clip(jnp.floor(src).astype(jnp.int32), 0, in_size - 1)
    i1 = jnp.minimum(i0 + 1, in_size - 1)
    w1 = src - i0.astype(jnp.float32)
    w0 = 1.0 - w1
    cols = jnp.arange(in_size, dtype=jnp.int32)
    m0 = (cols[None, :] == i0[:, None]).astype(jnp.float32)
    m1 = (cols[None, :] == i1[:, None]).astype(jnp.float32)
    # (out_size, in_size); rows sum to 1 even when i0 == i1 at the boundary.
    return w0[:, None] * m0 + w1[:, None] * m1


# ---------------------------------------------------------------------------
# Generation-aware VMEM budget (for block sizing) and scoped VMEM limit.
# ---------------------------------------------------------------------------
def _vmem_budget_and_limit():
    mib = 1024 * 1024
    cap = None
    try:
        cap = getattr(pltpu.get_tpu_info(), "vmem_capacity_bytes", None)
    except Exception:
        cap = None
    if cap is None:
        # Unknown generation: values safe on v7x (64 MiB/core) as well.
        return 32 * mib, 48 * mib
    if cap >= 96 * mib:
        # v5e / v6e: 128 MiB physical VMEM -> use most of it.
        limit = min(110 * mib, cap - 16 * mib)
        return min(96 * mib, limit - 8 * mib), limit
    # v7x-style: 64 MiB per TensorCore; leave compiler/internal-scratch headroom.
    limit = min(52 * mib, cap - 12 * mib)
    return min(40 * mib, limit - 8 * mib), limit


# ---------------------------------------------------------------------------
# Block (planes per grid step) and in-kernel chunk-size selection.
# ---------------------------------------------------------------------------
def _pick_blocking(b, h_in, w_in, h_out, w_pad, in_item, out_item, mat_item, budget):
    def sublane(item):
        return max(8, 32 // max(int(item), 1))   # 8 f32, 16 bf16, 32 int8/fp8

    sub_in, sub_out = sublane(in_item), sublane(out_item)

    # Smallest plane step that keeps both blocks sublane-aligned.
    step = 1
    while (step * h_in) % sub_in or (step * h_out) % sub_out:
        step += 1
        if step > 256:      # give up on alignment (perf only, never correctness)
            step = 1
            break

    # Per-plane VMEM cost: double-buffered input + output blocks (dtype-aware).
    bytes_per_plane = 2 * h_in * w_in * in_item + 2 * h_out * w_pad * out_item
    fixed = 2 * mat_item * (h_out * h_in + w_in * w_pad)     # interp matrices
    tb = int(max(1, (budget - fixed) // max(bytes_per_plane, 1)))
    tb = min(tb, b)

    if b >= 2 * step:
        # Keep >= 2 grid tiles so both v7x TensorCores get work.
        tb = min(tb, (b + 1) // 2)

    if tb < b:
        tb = max(step, (tb // step) * step)
        tb = min(tb, b)
        # Prefer an even tile count (v7x two-core load balance).
        t = tb
        for _ in range(64):
            if t < step or pl.cdiv(b, t) % 2 == 0:
                break
            t -= step
        if t >= step and pl.cdiv(b, t) % 2 == 0:
            tb = t

    # Planes fused per in-kernel chunk: ~8, divides tb, aligned if possible.
    divisors = [d for d in range(1, min(tb, 8) + 1) if tb % d == 0]
    aligned = [d for d in divisors
               if (d * h_in) % sub_in == 0 and (d * h_out) % sub_out == 0]
    ch = max(aligned) if aligned else max(divisors)
    return int(tb), int(ch)


# ---------------------------------------------------------------------------
# Pallas kernel: TB planes per grid step, fused per-chunk W-interp + H-interp.
# ---------------------------------------------------------------------------
def _upsample_kernel(ah_ref, awt_ref, x_ref, o_ref, *, ch, h_in, h_out,
                     n_chunks, compute_dtype):
    # ah_ref : (H_out, H_in)      row-interp matrix   (stationary)
    # awt_ref: (W_in, W_pad)      col-interp matrix^T (stationary, lane-dense)
    # x_ref  : (TB*H_in, W_in)    TB input planes stacked along rows
    # o_ref  : (TB*H_out, W_pad)  TB output planes stacked along rows
    ah = ah_ref[...]
    awt = awt_ref[...]
    rows_in = ch * h_in
    rows_out = ch * h_out

    def chunk_body(c):
        xoff = pl.multiple_of(c * rows_in, rows_in)
        ooff = pl.multiple_of(c * rows_out, rows_out)
        x_chunk = x_ref[pl.ds(xoff, rows_in), :].astype(compute_dtype)

        # 1) W-interp: one lane-dense MXU matmul for the whole chunk.
        y = jnp.dot(x_chunk, awt, preferred_element_type=jnp.float32)
        y = y.astype(compute_dtype)                       # (ch*H_in, W_pad)

        # 2) H-interp per plane with A_h stationary; write straight to the
        #    output block (no full-size scratch, no broadcast of A_h).
        for p in range(ch):
            yp = y[p * h_in:(p + 1) * h_in, :]
            op = jnp.dot(ah, yp, preferred_element_type=jnp.float32)
            o_ref[pl.ds(ooff + p * h_out, h_out), :] = op.astype(o_ref.dtype)

    if n_chunks == 1:
        chunk_body(0)
    else:
        def body(c, carry):
            chunk_body(c)
            return carry
        jax.lax.fori_loop(0, n_chunks, body, 0, unroll=(n_chunks <= 8))


# ---------------------------------------------------------------------------
# Wrapper: F.interpolate(x, scale_factor, mode='bilinear', align_corners)
# ---------------------------------------------------------------------------
@functools.partial(jax.jit, static_argnames=("scale_factor", "mode", "align_corners"))
def upsample(x, *, scale_factor, mode="bilinear", align_corners=False):
    """Pallas equivalent of F.interpolate for NCHW float inputs."""
    if mode != "bilinear":
        # TODO(synk): only 'bilinear' (the mode used by the SETR decode head) is implemented.
        raise NotImplementedError("only mode='bilinear' is implemented")

    n, c, h_in, w_in = x.shape
    # floor semantics match PyTorch for positive scales
    h_out = int(math.floor(h_in * scale_factor))
    w_out = int(math.floor(w_in * scale_factor))

    # bf16 inputs stay on the bf16 MXU path; everything else computes in f32.
    compute_dtype = jnp.bfloat16 if x.dtype == jnp.bfloat16 else jnp.float32
    mat_item = jnp.dtype(compute_dtype).itemsize

    # Lane-dense output stores: pad narrow outputs up to 128 lanes, slice later.
    w_pad = 128 if w_out < 128 else w_out

    a_h = _bilinear_matrix(h_out, h_in, align_corners).astype(compute_dtype)
    a_w_t = _bilinear_matrix(w_out, w_in, align_corners).T        # (W_in, W_out)
    if w_pad != w_out:
        a_w_t = jnp.pad(a_w_t, ((0, 0), (0, w_pad - w_out)))
    a_w_t = a_w_t.astype(compute_dtype)

    b = n * c
    budget, vmem_limit = _vmem_budget_and_limit()
    tb, ch = _pick_blocking(b, h_in, w_in, h_out, w_pad,
                            x.dtype.itemsize, x.dtype.itemsize, mat_item, budget)
    num_tiles = pl.cdiv(b, tb)
    n_chunks = tb // ch

    # Free reshape: planes stacked along the row axis (contiguous NCHW).
    x2 = x.reshape(b * h_in, w_in)

    kernel = functools.partial(_upsample_kernel, ch=ch, h_in=h_in, h_out=h_out,
                               n_chunks=n_chunks, compute_dtype=compute_dtype)

    out2 = pl.pallas_call(
        kernel,
        out_shape=jax.ShapeDtypeStruct((b * h_out, w_pad), x.dtype),
        grid_spec=pltpu.PrefetchScalarGridSpec(
            num_scalar_prefetch=0,
            grid=(num_tiles,),
            in_specs=[
                pl.BlockSpec((h_out, h_in), lambda i: (0, 0)),       # A_h (const)
                pl.BlockSpec((w_in, w_pad), lambda i: (0, 0)),       # A_w^T (const)
                pl.BlockSpec((tb * h_in, w_in), lambda i: (i, 0)),   # TB planes
            ],
            out_specs=pl.BlockSpec((tb * h_out, w_pad), lambda i: (i, 0)),
        ),
        compiler_params=pltpu.CompilerParams(
            dimension_semantics=("parallel",),
            vmem_limit_bytes=int(vmem_limit),
        ),
    )(a_h, a_w_t, x2)

    if w_pad != w_out:
        out2 = out2[:, :w_out]
    return out2.reshape(n, c, h_out, w_out)


# ---------------------------------------------------------------------------
# Pure-JAX reference (gather formulation) for the correctness check.
# ---------------------------------------------------------------------------
def _reference_bilinear(x, scale_factor, align_corners):
    n, c, h_in, w_in = x.shape
    h_out, w_out = int(h_in * scale_factor), int(w_in * scale_factor)

    def src_coords(out_size, in_size):
        o = jnp.arange(out_size, dtype=jnp.float32)
        if align_corners:
            src = o * (in_size - 1) / max(out_size - 1, 1)
        else:
            src = jnp.maximum((o + 0.5) * (in_size / out_size) - 0.5, 0.0)
        i0 = jnp.clip(jnp.floor(src).astype(jnp.int32), 0, in_size - 1)
        i1 = jnp.minimum(i0 + 1, in_size - 1)
        w1 = src - i0.astype(jnp.float32)
        return i0, i1, 1.0 - w1, w1

    h0, h1, wh0, wh1 = src_coords(h_out, h_in)
    w0, w1, ww0, ww1 = src_coords(w_out, w_in)

    xr = (x[:, :, h0, :] * wh0[None, None, :, None]
          + x[:, :, h1, :] * wh1[None, None, :, None])
    return (xr[:, :, :, w0] * ww0[None, None, None, :]
            + xr[:, :, :, w1] * ww1[None, None, None, :])


if __name__ == "__main__":
    key = jax.random.PRNGKey(0)
    # Small NCHW feature map consistent with the module.
    x = jax.random.normal(key, (2, 4, 16, 16), dtype=jnp.float32)

    scale_factor = 2
    align_corners = False  # SETR decode head uses bilinear, align_corners=False

    out = upsample(x, scale_factor=scale_factor, mode="bilinear",
                   align_corners=align_corners)
    out = jax.block_until_ready(out)
    ref = _reference_bilinear(x, scale_factor, align_corners)
    assert out.shape == (2, 4, 32, 32), out.shape
    assert jnp.allclose(out, ref, atol=1e-5, rtol=1e-5), float(
        jnp.max(jnp.abs(out - ref)))

    # Extra coverage: ragged final grid tile (b=3 planes) and align_corners=True.
    x2 = jax.random.normal(jax.random.PRNGKey(1), (1, 3, 16, 16), dtype=jnp.float32)
    out2 = jax.block_until_ready(
        upsample(x2, scale_factor=2, mode="bilinear", align_corners=True))
    ref2 = _reference_bilinear(x2, 2, True)
    assert out2.shape == (1, 3, 32, 32), out2.shape
    assert jnp.allclose(out2, ref2, atol=1e-5, rtol=1e-5), float(
        jnp.max(jnp.abs(out2 - ref2)))

    print("KERNEL_OK")
</pallas_src>

<mosaic_0001>
module attributes {stable_mosaic.version = 11 : i64} {
  func.func @_upsample_kernel(%arg0: i32, %arg1: memref<32x16xf32, #tpu.memory_space<vmem>>, %arg2: memref<16x128xf32, #tpu.memory_space<vmem>>, %arg3: memref<64x16xf32, #tpu.memory_space<vmem>>, %arg4: memref<128x128xf32, #tpu.memory_space<vmem>>) attributes {dimension_semantics = [#tpu.dimension_semantics<parallel>], iteration_bounds = array<i64: 2>, scalar_prefetch = 0 : i64, scratch_operands = 0 : i64, tpu.core_type = #tpu.core_type<tc>, window_params = [{pipeline_mode = #tpu.pipeline_mode<synchronous>, transform_indices = @transform_0, window_bounds = array<i64: 32, 16>}, {pipeline_mode = #tpu.pipeline_mode<synchronous>, transform_indices = @transform_1, window_bounds = array<i64: 16, 128>}, {transform_indices = @transform_2, window_bounds = array<i64: 64, 16>}, {transform_indices = @transform_3, window_bounds = array<i64: 128, 128>}]} {
    %c0 = arith.constant 0 : index
    %c0_0 = arith.constant 0 : index
    %0 = vector.load %arg1[%c0, %c0_0] : memref<32x16xf32, #tpu.memory_space<vmem>>, vector<32x16xf32>
    %c0_1 = arith.constant 0 : index
    %c0_2 = arith.constant 0 : index
    %1 = vector.load %arg2[%c0_1, %c0_2] : memref<16x128xf32, #tpu.memory_space<vmem>>, vector<16x128xf32>
    %c0_i32 = arith.constant 0 : i32
    %2 = tpu.assume_multiple %c0_i32, 64 : i32
    %c0_i32_3 = arith.constant 0 : i32
    %3 = tpu.assume_multiple %c0_i32_3, 128 : i32
    %4 = arith.index_cast %2 : i32 to index
    %c0_4 = arith.constant 0 : index
    %5 = vector.load %arg3[%4, %c0_4] : memref<64x16xf32, #tpu.memory_space<vmem>>, vector<64x16xf32>
    %cst = arith.constant dense<0.000000e+00> : vector<64x128xf32>
    %6 = tpu.matmul %5, %1, %cst {dimension_numbers = #tpu.dot_dimension_numbers<[1], [0], [0], [1], [0, 0, 1, 1], [], []>} : vector<64x16xf32>, vector<16x128xf32>, vector<64x128xf32> -> vector<64x128xf32>
    %7 = vector.extract_strided_slice %6 {offsets = [0, 0], sizes = [16, 128], strides = [1, 1]} : vector<64x128xf32> to vector<16x128xf32>
    %cst_5 = arith.constant dense<0.000000e+00> : vector<32x128xf32>
    %8 = tpu.matmul %0, %7, %cst_5 {dimension_numbers = #tpu.dot_dimension_numbers<[1], [0], [0], [1], [0, 0, 1, 1], [], []>} : vector<32x16xf32>, vector<16x128xf32>, vector<32x128xf32> -> vector<32x128xf32>
    %c0_i32_6 = arith.constant 0 : i32
    %9 = arith.addi %3, %c0_i32_6 : i32
    %10 = arith.index_cast %9 : i32 to index
    %c0_7 = arith.constant 0 : index
    %11 = vector.load %arg4[%10, %c0_7] : memref<128x128xf32, #tpu.memory_space<vmem>>, vector<32x128xf32>
    tpu.vector_store %arg4[%10, %c0_7], %8 {strides = array<i32>} : memref<128x128xf32, #tpu.memory_space<vmem>>, vector<32x128xf32>,
    %12 = vector.extract_strided_slice %6 {offsets = [16, 0], sizes = [16, 128], strides = [1, 1]} : vector<64x128xf32> to vector<16x128xf32>
    %cst_8 = arith.constant dense<0.000000e+00> : vector<32x128xf32>
    %13 = tpu.matmul %0, %12, %cst_8 {dimension_numbers = #tpu.dot_dimension_numbers<[1], [0], [0], [1], [0, 0, 1, 1], [], []>} : vector<32x16xf32>, vector<16x128xf32>, vector<32x128xf32> -> vector<32x128xf32>
    %c32_i32 = arith.constant 32 : i32
    %14 = arith.addi %3, %c32_i32 : i32
    %15 = arith.index_cast %14 : i32 to index
    %c0_9 = arith.constant 0 : index
    %16 = vector.load %arg4[%15, %c0_9] : memref<128x128xf32, #tpu.memory_space<vmem>>, vector<32x128xf32>
    tpu.vector_store %arg4[%15, %c0_9], %13 {strides = array<i32>} : memref<128x128xf32, #tpu.memory_space<vmem>>, vector<32x128xf32>,
    %17 = vector.extract_strided_slice %6 {offsets = [32, 0], sizes = [16, 128], strides = [1, 1]} : vector<64x128xf32> to vector<16x128xf32>
    %cst_10 = arith.constant dense<0.000000e+00> : vector<32x128xf32>
    %18 = tpu.matmul %0, %17, %cst_10 {dimension_numbers = #tpu.dot_dimension_numbers<[1], [0], [0], [1], [0, 0, 1, 1], [], []>} : vector<32x16xf32>, vector<16x128xf32>, vector<32x128xf32> -> vector<32x128xf32>
    %c64_i32 = arith.constant 64 : i32
    %19 = arith.addi %3, %c64_i32 : i32
    %20 = arith.index_cast %19 : i32 to index
    %c0_11 = arith.constant 0 : index
    %21 = vector.load %arg4[%20, %c0_11] : memref<128x128xf32, #tpu.memory_space<vmem>>, vector<32x128xf32>
    tpu.vector_store %arg4[%20, %c0_11], %18 {strides = array<i32>} : memref<128x128xf32, #tpu.memory_space<vmem>>, vector<32x128xf32>,
    %22 = vector.extract_strided_slice %6 {offsets = [48, 0], sizes = [16, 128], strides = [1, 1]} : vector<64x128xf32> to vector<16x128xf32>
    %cst_12 = arith.constant dense<0.000000e+00> : vector<32x128xf32>
    %23 = tpu.matmul %0, %22, %cst_12 {dimension_numbers = #tpu.dot_dimension_numbers<[1], [0], [0], [1], [0, 0, 1, 1], [], []>} : vector<32x16xf32>, vector<16x128xf32>, vector<32x128xf32> -> vector<32x128xf32>
    %c96_i32 = arith.constant 96 : i32
    %24 = arith.addi %3, %c96_i32 : i32
    %25 = arith.index_cast %24 : i32 to index
    %c0_13 = arith.constant 0 : index
    %26 = vector.load %arg4[%25, %c0_13] : memref<128x128xf32, #tpu.memory_space<vmem>>, vector<32x128xf32>
    tpu.vector_store %arg4[%25, %c0_13], %23 {strides = array<i32>} : memref<128x128xf32, #tpu.memory_space<vmem>>, vector<32x128xf32>,
    return
  }
  func.func @transform_0(%arg0: i32) -> (i32, i32) {
    %c0_i32 = arith.constant 0 : i32
    %c0_i32_0 = arith.constant 0 : i32
    %c0_i32_1 = arith.constant 0 : i32
    return %c0_i32, %c0_i32_0 : i32, i32
  }
  func.func @transform_1(%arg0: i32) -> (i32, i32) {
    %c0_i32 = arith.constant 0 : i32
    %c0_i32_0 = arith.constant 0 : i32
    %c0_i32_1 = arith.constant 0 : i32
    return %c0_i32, %c0_i32_0 : i32, i32
  }
  func.func @transform_2(%arg0: i32) -> (i32, i32) {
    %c0_i32 = arith.constant 0 : i32
    %c0_i32_0 = arith.constant 0 : i32
    return %arg0, %c0_i32 : i32, i32
  }
  func.func @transform_3(%arg0: i32) -> (i32, i32) {
    %c0_i32 = arith.constant 0 : i32
    %c0_i32_0 = arith.constant 0 : i32
    return %arg0, %c0_i32 : i32, i32
  }
}

</mosaic_0001>

<bundles_post_ra>
// kernel: upsample.1
= control target key start
LH: loop header
LB: loop body
LE: loop exit
PB: predicated region body
PF: predicated region fallthrough
CT: control target
= control target key end

     0   :  { %8 = vsyncpa [#allocation3], 0  ;;  %s1359_s0 = inlined_call_operand.vmem [shape: f32[32,16], index: 0, kind: input, shape index: {}]   ;;  %s1360_s1 = inlined_call_operand.vmem [shape: f32[16,128], index: 1, kind: input, shape index: {}]   ;;  %s1361_s2 = inlined_call_operand.hbm [shape: f32[128,16], index: 2, kind: input, shape index: {}]   ;;  %s1362_s3 = inlined_call_operand.hbm [shape: f32[256,128], index: 3, kind: output, shape index: {}]  }
   0x1   :  { %10 = vsyncpa [#allocation3 + $0x1], 0 }
   0x2   :  { %11 = vsyncpa [#allocation4], 0 }
   0x3   :  { %13 = vsyncpa [#allocation4 + $0x1], 0  ;;  %s1135_s12 = smov 0   ;;  %s1137_s13 = smov 0  }
   0x4   :  { %s1139_s14 = smov 0   ;;  %s1141_s15 = smov 0  }
   0x5 LB: > { %s1156_s16 = sadd.s32 4294967295, %s1107_s15   ;;  %s799_s17 = sadd.s32 4294967294, %s1107_s15   ;;  %s1107_s15 = sphi %s1141_s15, %s1375_s15   ;;  %s1103_s14 = sphi %s1139_s14, %s1374_s14   ;;  %s1099_s13 = sphi %s1137_s13, %s1373_s13   ;;  %s1095_s12 = sphi %s1135_s12, %s1372_s12  }
   0x6   : > { %s1160_s18 = sadd.s32 1, %s1107_s15   ;;  %s68_s19 = sadd.s32 1, %s1103_s14 }
   0x7   : > { %s65_s20 = ssub.s32 %s1107_s15, %s1160_s18  ;;  %p75_p0 = scmp.ne.s32.totalorder %s1103_s14, %s1099_s13 }
   0x8   : > { %p66_p1 = scmp.eq.s32.totalorder %s65_s20, 0  ;;  %p76_p2 = scmp.eq.s32.totalorder %s1107_s15, 0 }
   0x9   : > { %p81_p3 = scmp.ne.s32.totalorder %s1099_s13, %s1095_s12  ;;  %p82_p4 = scmp.eq.s32.totalorder %s1156_s16, 0 }
   0xa   : > { %s1172_s21 = scalar_select %p66_p1, %s1103_s14, %s68_s19  }
   0xb   : > { %p1174_p5 = por %p76_p2, %p75_p0  ;;  %p1178_p6 = por %p82_p4, %p81_p3 }
   0xc   : > { %p105_p7 = scmp.eq.s32.totalorder %s1156_s16, 1  ;;  %p111_p8 = scmp.eq.s32.totalorder %s799_s17, 1 }
   0xd   : > { %p973_p10 = scmp.lt.s32.totalorder %s1107_s15, 2  ;;  %s137_s26 = sand.u32 1, %s1103_s14  }
   0xe   : > { %p1185_p11 = por %p105_p7, %p75_p0  ;;  %p1189_p12 = por %p111_p8, %p81_p3 }
   0xf   : > { %s849_s27 = sshll.u32 %s1107_s15, 10  ;;  %s802_s28 = sshll.u32 %s137_s26, 6 }
  0x10   : > { %s1366_s24 = scalar_select %p1185_p11, 1, 0 }
  0x11   : > { %s1367_s25 = scalar_select %p1189_p12, 1, 0 }
  0x12   : > { %s1198_s4 = scalar_lea.hbm %s1361_s2, %s849_s27  ;;  %s141_s5 = scalar_lea.vmem [#allocation2], %s802_s28 }
  0x13   : > { %s148_s6 = sshll.u32 %s141_s5, 4  ;;  %p1202_p13 = pnand %p973_p10, %p1174_p5  ;;  %s1206_s6 = int_to_ptr.vmem [resolvable:$true] %s148_s6 }
  0x14   : > { %s1208_s8 = scalar_lea.sflag [#allocation3], %s137_s26  ;;  %s1011_s9 = scalar_lea.hbm %s1198_s4, 1024 }
  0x15   : > { %p1012_p0 = scmp.ne.s32.totalorder %s1198_s4, %s1011_s9  ;;  %p1013_p1 = pneg %p1202_p13 }
  0x16   : > { %s1016_s17 = scalar_lea.hbm %s1361_s2, 2048  ;;  %p1017_p4 = scmp.lt.u32.totalorder %s1198_s4, %s1361_s2 }
  0x17   : > { %p1014_p2 = pnand %p1013_p1, %p1012_p0  ;;  %p1018_p5 = scmp.lt.u32.totalorder %s1016_s17, %s1011_s9 }
  0x18   : > { %p1020_p8 = scmp.lt.u32.totalorder %s1011_s9, %s1198_s4 }
  0x19   : > { %p1015_p3 = pneg %p1014_p2  ;;  %p1019_p7 = por %p1018_p5, %p1017_p4 }
  0x1b   : > { %p1021_p10 = por %p1020_p8, %p1019_p7 }
  0x1d   : > { %p1022_p9 = pnand %p1021_p10, %p1015_p3 }
  0x1f   : > { %1025 = shalt.err (!%p1022_p9)
}
  0x20   : > { %s1026_s22 = scalar_lea.vmem %s1206_s6, 1024  ;;  %s1109_s26 = smov [#allocation2]  }
  0x21   : > { %p1027_p0 = scmp.ne.s32.totalorder %s1206_s6, %s1026_s22  ;;  %s1031_s27 = sshll.u32 %s1109_s26, 4  ;;  %s1032_s27 = int_to_ptr.vmem [resolvable:$false] %s1031_s27 }
  0x22   : > { %s1033_s28 = scalar_lea.vmem %s1032_s27, 2048  ;;  %p1034_p11 = scmp.lt.s32.totalorder %s1206_s6, %s1032_s27 }
  0x23   : > { %p1029_p2 = pnand %p1027_p0, %p1013_p1  ;;  %p1035_p4 = scmp.lt.s32.totalorder %s1033_s28, %s1026_s22 }
  0x25   : > { %p1030_p12 = pneg %p1029_p2  ;;  %p1036_p5 = por %p1035_p4, %p1034_p11 }
  0x27   : > { %p1037_p7 = pnand %p1036_p5, %p1030_p12 }
  0x29   : > { %1040 = shalt.err (!%p1037_p7)
}
  0x2a   : > { %s1110_s29 = smov 128   ;;  %s1111_s30 = smov 8  }
  0x2b   : > { %968 = dma.hbm_to_vmem [thread:$0]  (!%p1202_p13), %s1198_s4, 1024, %s1206_s6, %s1208_s8, %s1110_s29, %s1110_s29, %s1111_s30  }
  0x2c   : > { %p805_p9 = scmp.ge.s32.totalorder %s1107_s15, 1  ;;  %p156_p1 = scmp.lt.s32.totalorder %s1107_s15, 3 }
  0x2e   : > { %p157_p3 = pnand %p805_p9, %p156_p1 }
  0x2f   : > { %s1239_s5 = sand.u32 (!%p157_p3), 1, %s1099_s13  }
  0x30   : > { %160 = sbr.rel (%p157_p3) target bundleno = 530 (0x212), region = 32  ;;  %s806_s9 = sshll.u32 (!%p157_p3), %s1239_s5, 6 }
  0x31   : > { %s163_s10 = scalar_lea.sflag (!%p157_p3), [#allocation3], %s1239_s5  ;;  %s166_s11 = scalar_lea.vmem (!%p157_p3), [#allocation2], %s806_s9 }
  0x37   : > { %1086 = dma.done.wait (%p1178_p6), %s163_s10, 1024  }
  0x38   : > { %1088 = vsyncadd (%p1178_p6), %s163_s10, 4294966272  ;;  %vm205_vm0 = vcmask 130048   ;;  %v195_v0 = vld [vmem:[%s1360_s1] sm:$0xff]  ;;  %v196_v1 = vld [vmem:[%s1360_s1 + $0x8] sm:$0xff]  ;;  %s807_s29 = sshll.u32 %s1239_s5, 7  ;;  %s850_s9 = sshll.u32 %s1156_s16, 11 }
  0x39   : > { %v197_v2 = vld [vmem:[%s166_s11] sm:$0xff]  ;;  %v941_v3 = vpack.c.bf16 %v196_v1, %v195_v0  ;;  %v198_v4 = vld [vmem:[%s166_s11 + $0x8] sm:$0xff]  ;;  %v199_v5 = vld [vmem:[%s166_s11 + $0x10] sm:$0xff]  ;;  %s1290_s30 = scalar_lea.vmem [#allocation5], %s807_s29  ;;  %s1311_s6 = scalar_lea.hbm %s1362_s3, %s850_s9 }
  0x3a   : > { %889 = vmatprep.mubr.msk.f32.mxu0 %vm205_vm0, %v197_v2  ;;  %v200_v6 = vld [vmem:[%s166_s11 + $0x18] sm:$0xff]  ;;  %v201_v7 = vld [vmem:[%s166_s11 + $0x20] sm:$0xff]  ;;  %v202_v8 = vld [vmem:[%s166_s11 + $0x28] sm:$0xff]  ;;  %s723_s10 = sshll.u32 %s1290_s30, 4  ;;  %s710_s7 = scalar_lea.sflag [#allocation4], %s1239_s5  ;;  %s1313_s10 = int_to_ptr.vmem [resolvable:$true] %s723_s10 }
  0x3b   : > { %942 = vmatprep.subr.bf16.mxu0 %v941_v3  ;;  %v203_v9 = vld [vmem:[%s166_s11 + $0x30] sm:$0xff]  ;;  %v204_v10 = vld [vmem:[%s166_s11 + $0x38] sm:$0xff]  ;;  %v191_v11 = vld [vmem:[%s1359_s0] sm:$0xff]  ;;  %s1041_s16 = scalar_lea.vmem %s1313_s10, 2048  ;;  %p1369_p11 = scmp.ne.s32.totalorder %s1366_s24, 0 }
  0x3c   : > { %944 = vmatpush3.bf16.msra.mxu0 %v941_v3  ;;  %905 = vmatprep.mubr.msk.f32.mxu1 %vm205_vm0, %v191_v11  ;;  %v192_v17 = vld [vmem:[%s1359_s0 + $0x8] sm:$0xff]  ;;  %v193_v19 = vld [vmem:[%s1359_s0 + $0x10] sm:$0xff]  ;;  %v194_v22 = vld [vmem:[%s1359_s0 + $0x18] sm:$0xff]  ;;  %p1042_p6 = scmp.ne.s32.totalorder %s1313_s10, %s1041_s16  ;;  %s1112_s8 = smov [#allocation5]  }
  0x3d   : > { %s1045_s23 = sshll.u32 %s1112_s8, 4  ;;  %s1046_s23 = int_to_ptr.vmem [resolvable:$false] %s1045_s23 }
  0x3e   : > { %p1043_p12 = pnand %p1042_p6, %p1369_p11  ;;  %s1047_s17 = scalar_lea.vmem %s1046_s23, 4096 }
  0x3f   : > { %890 = vmatmul.mubr.msk.f32.vlgmr.msra.gmra.mrb[0].mxu0 %vm205_vm0, %v198_v4  ;;  %p1048_p8 = scmp.lt.s32.totalorder %s1313_s10, %s1046_s23  ;;  %p1049_p10 = scmp.lt.s32.totalorder %s1047_s17, %s1041_s16 }
  0x40   : > { %892 = vmatprep.mubr.msk.f32.mxu0 %vm205_vm0, %v199_v5  ;;  %p1044_p13 = pneg %p1043_p12 }
  0x41   : > { %p1050_p0 = por %p1049_p10, %p1048_p8 }
  0x43   : > { %893 = vmatmul.mubr.msk.f32.gmra.mrb[2].mxu0 %vm205_vm0, %v200_v6  ;;  %p1051_p2 = pnand %p1050_p0, %p1044_p13 }
  0x44   : > { %895 = vmatprep.mubr.msk.f32.mxu0 %vm205_vm0, %v201_v7 }
  0x47   : > { %896 = vmatmul.mubr.msk.f32.gmra.mrb[4].mxu0 %vm205_vm0, %v202_v8 }
  0x48   : > { %898 = vmatprep.mubr.msk.f32.mxu0 %vm205_vm0, %v203_v9 }
  0x4b   : > { %899 = vmatmul.mubr.msk.f32.gmra.mrb[6].mxu0 %vm205_vm0, %v204_v10 }
  0x4c   : > { %925 = vmatprep.mubr.msk.f32.mxu0 %vm205_vm0, %v191_v11 }
 0x112   : > { %v891_v12 = vpop.f32.mrb[0].mxu0 }
 0x113   : > { %v296_v13 = vpop.f32.mrb[1].mxu0 }
 0x114   : > { %v945_v14 = vpack.c.bf16 %v891_v12, %v296_v13 }
 0x116   : > { %v894_v15 = vpop.f32.mrb[2].mxu0  ;;  %946 = vmatprep.subr.bf16.mxu1 %v945_v14 }
 0x117   : > { %v306_v16 = vpop.f32.mrb[3].mxu0  ;;  %948 = vmatpush3.bf16.msra.mxu1 %v945_v14 }
 0x118   : > { %v949_v18 = vpack.c.bf16 %v894_v15, %v306_v16 }
 0x11a   : > { %v897_v20 = vpop.f32.mrb[4].mxu0  ;;  %950 = vmatprep.subr.bf16.mxu1 %v949_v18  ;;  %906 = vmatmul.mubr.msk.f32.vlgmr.msra.gmra.mrb[0].mxu1 %vm205_vm0, %v192_v17 }
 0x11b   : > { %v316_v21 = vpop.f32.mrb[5].mxu0  ;;  %952 = vmatpush3.bf16.msra.mxu1 %v949_v18  ;;  %908 = vmatprep.mubr.msk.f32.mxu1 %vm205_vm0, %v193_v19 }
 0x11c   : > { %v953_v23 = vpack.c.bf16 %v897_v20, %v316_v21 }
 0x11e   : > { %954 = vmatprep.subr.bf16.mxu0 %v953_v23  ;;  %v900_v24 = vpop.f32.mrb[6].mxu0  ;;  %909 = vmatmul.mubr.msk.f32.gmra.mrb[2].mxu1 %vm205_vm0, %v194_v22 }
 0x11f   : > { %956 = vmatpush3.bf16.msra.mxu0 %v953_v23  ;;  %v326_v25 = vpop.f32.mrb[7].mxu0  ;;  %915 = vmatprep.mubr.msk.f32.mxu1 %vm205_vm0, %v191_v11 }
 0x120   : > { %v957_v26 = vpack.c.bf16 %v900_v24, %v326_v25 }
 0x122   : > { %958 = vmatprep.subr.bf16.mxu1 %v957_v26  ;;  %916 = vmatmul.mubr.msk.f32.vlgmr.msra.gmra.mrb[4].mxu1 %vm205_vm0, %v192_v17 }
 0x123   : > { %960 = vmatpush3.bf16.msra.mxu1 %v957_v26  ;;  %918 = vmatprep.mubr.msk.f32.mxu1 %vm205_vm0, %v193_v19 }
 0x124   : > { %926 = vmatmul.mubr.msk.f32.vlgmr.msra.gmra.mrb[8].mxu0 %vm205_vm0, %v192_v17 }
 0x125   : > { %928 = vmatprep.mubr.msk.f32.mxu0 %vm205_vm0, %v193_v19 }
 0x126   : > { %919 = vmatmul.mubr.msk.f32.gmra.mrb[6].mxu1 %vm205_vm0, %v194_v22 }
 0x127   : > { %935 = vmatprep.mubr.msk.f32.mxu1 %vm205_vm0, %v191_v11 }
 0x128   : > { %929 = vmatmul.mubr.msk.f32.gmra.mrb[10].mxu0 %vm205_vm0, %v194_v22 }
 0x12a   : > { %936 = vmatmul.mubr.msk.f32.vlgmr.msra.gmra.mrb[8].mxu1 %vm205_vm0, %v192_v17 }
 0x12b   : > { %938 = vmatprep.mubr.msk.f32.mxu1 %vm205_vm0, %v193_v19 }
 0x12e   : > { %939 = vmatmul.mubr.msk.f32.gmra.mrb[10].mxu1 %vm205_vm0, %v194_v22 }
 0x1ed   : > { %v907_v27 = vpop.f32.mrb[0].mxu1 }
 0x1ee   : > { %433 = vst [vmem:[%s1290_s30 + $0x8] sm:$0xff] %v907_v27  ;;  %v413_v28 = vpop.f32.mrb[1].mxu1 }
 0x1ef   : > { %432 = vst [vmem:[%s1290_s30] sm:$0xff] %v413_v28 }
 0x1f1   : > { %v910_v29 = vpop.f32.mrb[2].mxu1 }
 0x1f2   : > { %435 = vst [vmem:[%s1290_s30 + $0x18] sm:$0xff] %v910_v29  ;;  %v423_v30 = vpop.f32.mrb[3].mxu1 }
 0x1f3   : > { %434 = vst [vmem:[%s1290_s30 + $0x10] sm:$0xff] %v423_v30 }
 0x1f5   : > { %v917_v31 = vpop.f32.mrb[4].mxu1 }
 0x1f6   : > { %825 = vst [vmem:[%s1290_s30 + $0x28] sm:$0xff] %v917_v31  ;;  %v502_v32 = vpop.f32.mrb[5].mxu1 }
 0x1f7   : > { %824 = vst [vmem:[%s1290_s30 + $0x20] sm:$0xff] %v502_v32  ;;  %v927_v33 = vpop.f32.mrb[8].mxu0 }
 0x1f8   : > { %833 = vst [vmem:[%s1290_s30 + $0x48] sm:$0xff] %v927_v33  ;;  %v593_v34 = vpop.f32.mrb[9].mxu0 }
 0x1f9   : > { %v920_v35 = vpop.f32.mrb[6].mxu1  ;;  %832 = vst [vmem:[%s1290_s30 + $0x40] sm:$0xff] %v593_v34 }
 0x1fa   : > { %827 = vst [vmem:[%s1290_s30 + $0x38] sm:$0xff] %v920_v35  ;;  %v512_v36 = vpop.f32.mrb[7].mxu1 }
 0x1fb   : > { %826 = vst [vmem:[%s1290_s30 + $0x30] sm:$0xff] %v512_v36  ;;  %v930_v37 = vpop.f32.mrb[10].mxu0 }
 0x1fc   : > { %835 = vst [vmem:[%s1290_s30 + $0x58] sm:$0xff] %v930_v37  ;;  %v603_v38 = vpop.f32.mrb[11].mxu0 }
 0x1fd   : > { %v937_v39 = vpop.f32.mrb[8].mxu1  ;;  %834 = vst [vmem:[%s1290_s30 + $0x50] sm:$0xff] %v603_v38 }
 0x1fe   : > { %841 = vst [vmem:[%s1290_s30 + $0x68] sm:$0xff] %v937_v39  ;;  %v684_v40 = vpop.f32.mrb[9].mxu1 }
 0x1ff   : > { %840 = vst [vmem:[%s1290_s30 + $0x60] sm:$0xff] %v684_v40 }
 0x201   : > { %v940_v41 = vpop.f32.mrb[10].mxu1 }
 0x202   : > { %843 = vst [vmem:[%s1290_s30 + $0x78] sm:$0xff] %v940_v41  ;;  %v694_v42 = vpop.f32.mrb[11].mxu1 }
 0x203   : > { %842 = vst [vmem:[%s1290_s30 + $0x70] sm:$0xff] %v694_v42 }
 0x204   : > { %1054 = shalt.err (!%p1051_p2)
}
 0x205   : > { %s1055_s19 = scalar_lea.hbm %s1311_s6, 2048  ;;  %s1059_s26 = scalar_lea.hbm %s1362_s3, 4096 }
 0x206   : > { %p1056_p4 = scmp.ne.s32.totalorder %s1311_s6, %s1055_s19  ;;  %p1060_p9 = scmp.lt.u32.totalorder %s1311_s6, %s1362_s3 }
 0x207   : > { %p1061_p1 = scmp.lt.u32.totalorder %s1059_s26, %s1055_s19  ;;  %p1063_p6 = scmp.lt.u32.totalorder %s1055_s19, %s1311_s6 }
 0x208   : > { %p1057_p5 = pnand %p1056_p4, %p1369_p11 }
 0x209   : > { %p1062_p3 = por %p1061_p1, %p1060_p9 }
 0x20a   : > { %p1058_p7 = pneg %p1057_p5 }
 0x20b   : > { %p1064_p12 = por %p1063_p6, %p1062_p3 }
 0x20d   : > { %p1065_p13 = pnand %p1064_p12, %p1058_p7 }
 0x20f   : > { %1068 = shalt.err (!%p1065_p13)
}
 0x210   : > { %s1113_s29 = smov 128   ;;  %s1114_s30 = smov 8  }
 0x211   : > { %963 = dma.vmem_to_hbm [thread:$0]  (%p1369_p11), %s1313_s10, 2048, %s1311_s6, %s710_s7, %s1113_s29, %s1113_s29, %s1114_s30  }
 0x212 PF: > { %s738_s9 = sand.u32 1, %s1095_s12   ;;  %p1370_p8 = scmp.ne.s32.totalorder %s1367_s25, 0 }
 0x213   : > { %p1371_p10 = scmp.ge.s32.totalorder %s1107_s15, 2  ;;  %s739_s11 = scalar_lea.sflag [#allocation4], %s738_s9 }
 0x215   : > { %p970_p0 = pnand %p1371_p10, %p1370_p8 }
 0x217   : > { %1090 = dma.done.wait (!%p970_p0), %s739_s11, 2048  }
 0x218   : > { %1092 = vsyncadd (!%p970_p0), %s739_s11, 4294965248  ;;  %p16_p2 = scmp.ge.s32.totalorder %s1160_s18, 4   ;;  %s1372_s12 = smov %s1099_s13 }
 0x219   : > { %s1373_s13 = smov %s1103_s14  ;;  %s1374_s14 = smov %s1172_s21 }
 0x21a   : > { %s1375_s15 = smov %s1160_s18  ;;  %18 = sbr.rel (!%p16_p2) target bundleno = 5 (0x5), region = 80 }
 0x221   :  { %744 = vsyncpa [#allocation3], 1 }
 0x222   :  { %746 = vsyncpa [#allocation3 + $0x1], 1 }
 0x223   :  { %747 = vsyncpa [#allocation4], 1 }
 0x224   :  { %749 = vsyncpa [#allocation4 + $0x1], 1 }

</bundles_post_ra>
